<compile_context>
chip_gen: v7x
topology: tpu7x:2x2x1
jax: 0.10.0
libtpu: 0.0.40
codegen_flags: <defaults>
</compile_context>

<pallas_src>
import math
import functools

import jax
import jax.numpy as jnp
from jax.experimental import pallas as pl
from jax.experimental.pallas import tpu as pltpu


# -----------------------------------------------------------------------------
# Shared in-kernel FCNet compute: fc1 -> relu -> fc2 -> relu -> fc3.
# Biases come in as one concatenated (1, 512+256+emb) f32 buffer.
# Dot operands are cast to the weight dtype (bf16); accumulation is f32.
# -----------------------------------------------------------------------------
def _bias_slices(b_ref, h1_dim, h2_dim, emb_dim):
    b1 = b_ref[:, 0:h1_dim]
    b2 = b_ref[:, h1_dim:h1_dim + h2_dim]
    b3 = b_ref[:, h1_dim + h2_dim:h1_dim + h2_dim + emb_dim]
    return b1, b2, b3


def _fcnet_compute(x_ref, w1_ref, w2_ref, w3_ref, b_ref, h1_dim, h2_dim, emb_dim):
    cdt = w1_ref.dtype
    b1, b2, b3 = _bias_slices(b_ref, h1_dim, h2_dim, emb_dim)
    x = x_ref[...].astype(cdt)
    h1 = jnp.maximum(
        jnp.dot(x, w1_ref[...], preferred_element_type=jnp.float32) + b1, 0.0)
    h2 = jnp.maximum(
        jnp.dot(h1.astype(cdt), w2_ref[...], preferred_element_type=jnp.float32) + b2, 0.0)
    return jnp.dot(h2.astype(cdt), w3_ref[...], preferred_element_type=jnp.float32) + b3


# -----------------------------------------------------------------------------
# Kernel 1: FCNet forward only (embed=True path).
# -----------------------------------------------------------------------------
def fcnet_kernel(x_ref, w1_ref, w2_ref, w3_ref, b_ref, out_ref, *,
                 h1_dim, h2_dim, emb_dim):
    out_ref[...] = _fcnet_compute(x_ref, w1_ref, w2_ref, w3_ref, b_ref,
                                  h1_dim, h2_dim, emb_dim)


def fcnet_forward(x, params):
    w1t, w2t, w3t, b_cat = params
    n, in_f = x.shape
    h1_dim, h2_dim, emb_dim = w1t.shape[1], w2t.shape[1], w3t.shape[1]
    vmem = pl.BlockSpec(memory_space=pltpu.MemorySpace.VMEM)

    flops = 2 * n * (in_f * h1_dim + h1_dim * h2_dim + h2_dim * emb_dim)
    bytes_accessed = int(x.nbytes + w1t.nbytes + w2t.nbytes + w3t.nbytes
                         + b_cat.nbytes + n * emb_dim * 4)

    # TODO(synk): (n, emb_dim=32) output is lane-sparse (<128 lanes); fine at this
    # size, but keep the last dim a multiple of 128 if the embed path becomes hot.
    kern = functools.partial(fcnet_kernel, h1_dim=h1_dim, h2_dim=h2_dim,
                             emb_dim=emb_dim)
    return pl.pallas_call(
        kern,
        out_shape=jax.ShapeDtypeStruct((n, emb_dim), jnp.float32),
        in_specs=[vmem] * 5,
        out_specs=vmem,
        cost_estimate=pl.CostEstimate(
            flops=flops, transcendentals=0, bytes_accessed=bytes_accessed),
    )(x, w1t, w2t, w3t, b_cat)


# -----------------------------------------------------------------------------
# Kernel 2 (fused): FCNet + AngularPenaltySMLoss (arcface) with labels.
# Reproduces the PyTorch reference exactly, including that the in-loop
# `W = F.normalize(W, ...)` does NOT modify the arc weights (local rebind),
# so the projection uses the raw weights while the embedding IS L2-normalized.
#   cos(acos(t) + m) = t*cos(m) - sqrt(1 - t^2)*sin(m)   (t clamped away from +-1)
#   excl_sum = sum_j exp(s*wf[i,j]) - exp(s*wf[i, y_i])  (exact, fewer selects)
# -----------------------------------------------------------------------------
def fused_arcface_kernel(x_ref, w1_ref, w2_ref, w3_ref, b_ref, arcw_ref,
                         labels_ref, loss_ref, *,
                         s, m, eps, n_batch, h1_dim, h2_dim, emb_dim):
    # ---- FCNet (embedding stays in vregs/VMEM) ----
    emb = _fcnet_compute(x_ref, w1_ref, w2_ref, w3_ref, b_ref,
                         h1_dim, h2_dim, emb_dim)                    # (N, E) f32

    # ---- F.normalize(p=2, dim=1): x / max(||x||, 1e-12) via rsqrt (EUP) ----
    sumsq = jnp.sum(emb * emb, axis=1, keepdims=True)
    xn = emb * jax.lax.rsqrt(jnp.maximum(sumsq, 1e-24))

    # ---- projection against (un-normalized, per reference bug) arc weights.
    #      Tiny (N,32)x(32,C) matmul kept in f32: loss-critical, negligible DMA.
    wf = jnp.dot(xn, arcw_ref[...], preferred_element_type=jnp.float32)  # (N, C)
    n, c = wf.shape

    # ---- one-hot mask from SMEM label scalars (no VMEM labels DMA) ----
    col = jax.lax.broadcasted_iota(jnp.int32, (n, c), 1)
    row = jax.lax.broadcasted_iota(jnp.int32, (n, c), 0)
    lab = jnp.zeros((n, c), jnp.int32)
    for i in range(n):  # n is small & static; unrolled scalar broadcasts
        lab = jnp.where(row == i, labels_ref[i], lab)
    is_label = col == lab

    diag = jnp.sum(jnp.where(is_label, wf, 0.0), axis=1, keepdims=True)  # wf[i, y_i]
    t = jnp.clip(diag, -1.0 + eps, 1.0 - eps)
    cos_m = math.cos(m)
    sin_m = math.sin(m)
    numerator = s * (t * cos_m - jnp.sqrt(1.0 - t * t) * sin_m)  # s*cos(acos(t)+m)

    # exclude-label column sum without a second masked reduce
    excl_sum = (jnp.sum(jnp.exp(s * wf), axis=1, keepdims=True)
                - jnp.exp(s * diag))
    denominator = jnp.exp(numerator) + excl_sum
    L = numerator - jnp.log(denominator)                          # (N, 1)

    # ---- scalar result straight to SMEM ----
    loss_ref[0, 0] = jnp.sum(L) * (-1.0 / float(n_batch))


def fused_arcface_loss(x, params, arc_wt, labels, *, s, m, eps=1e-7):
    w1t, w2t, w3t, b_cat = params
    n, in_f = x.shape
    h1_dim, h2_dim, emb_dim = w1t.shape[1], w2t.shape[1], w3t.shape[1]
    c = arc_wt.shape[1]
    labels1d = labels.reshape(n).astype(jnp.int32)

    vmem = pl.BlockSpec(memory_space=pltpu.MemorySpace.VMEM)
    smem = pl.BlockSpec(memory_space=pltpu.MemorySpace.SMEM)

    flops = 2 * n * (in_f * h1_dim + h1_dim * h2_dim + h2_dim * emb_dim + emb_dim * c)
    transcendentals = n * (c + 5)  # exp row + exp(num) + exp(s*diag) + log + rsqrt + sqrt
    bytes_accessed = int(x.nbytes + w1t.nbytes + w2t.nbytes + w3t.nbytes
                         + b_cat.nbytes + arc_wt.nbytes + labels1d.nbytes + 4)

    kern = functools.partial(fused_arcface_kernel, s=float(s), m=float(m),
                             eps=float(eps), n_batch=n,
                             h1_dim=h1_dim, h2_dim=h2_dim, emb_dim=emb_dim)
    out = pl.pallas_call(
        kern,
        out_shape=jax.ShapeDtypeStruct((1, 1), jnp.float32),
        in_specs=[vmem, vmem, vmem, vmem, vmem, vmem, smem],
        out_specs=smem,
        cost_estimate=pl.CostEstimate(
            flops=flops, transcendentals=transcendentals,
            bytes_accessed=bytes_accessed),
    )(x, w1t, w2t, w3t, b_cat, arc_wt, labels1d)
    return out[0, 0]


# -----------------------------------------------------------------------------
# TESTMODEL wrapper
# -----------------------------------------------------------------------------
def init_params(key, in_feature, out_features, *, compute_dtype=jnp.bfloat16):
    """Deterministic parameter init matching the module's shapes.

    FCNet weights are stored pre-transposed [in, out] in `compute_dtype` (bf16
    by default: halves weight DMA, native MXU path on v6e/v7x).  Biases are
    concatenated into one (1, 512+256+emb) f32 buffer.  The arc weight stays
    f32 (tiny, loss-critical)."""
    emb_dim = out_features * 2
    keys = jax.random.split(key, 4)

    def lin(k, fan_in, fan_out):
        bound = 1.0 / math.sqrt(fan_in)
        kw, kb = jax.random.split(k)
        w = jax.random.uniform(kw, (fan_out, fan_in), jnp.float32, -bound, bound)
        b = jax.random.uniform(kb, (fan_out,), jnp.float32, -bound, bound)
        return w.T, b  # pre-transposed to [in, out]

    w1t, b1 = lin(keys[0], in_feature, 512)
    w2t, b2 = lin(keys[1], 512, 256)
    w3t, b3 = lin(keys[2], 256, emb_dim)
    b_cat = jnp.concatenate([b1, b2, b3]).reshape(1, -1)

    # AngularPenaltySMLoss.fc: Linear(emb_dim -> out_features, bias=False)
    bound = 1.0 / math.sqrt(emb_dim)
    arc_w = jax.random.uniform(keys[3], (out_features, emb_dim), jnp.float32,
                               -bound, bound)
    params = (w1t.astype(compute_dtype), w2t.astype(compute_dtype),
              w3t.astype(compute_dtype), b_cat)
    return params, arc_w.T  # arc weight as [emb_dim, out_features], f32


def testmodel_forward(x, params, arc_wt, labels=None, embed=False, *, s, m):
    if embed:
        return fcnet_forward(x, params)
    if labels is None:
        # TODO(synk): reference calls self.adms_loss.predict(x), which does not exist
        # on AngularPenaltySMLoss (AttributeError in PyTorch); no equivalent to implement.
        return fcnet_forward(x, params)
    return fused_arcface_loss(x, params, arc_wt, labels, s=s, m=m)


# -----------------------------------------------------------------------------
# Pure-JAX reference (same bf16-operand / f32-accumulate dot treatment so the
# check is apples-to-apples; everything downstream of the dots is f32).
# -----------------------------------------------------------------------------
def _ref_forward_loss(x, params, arc_wt, labels, *, s, m, eps=1e-7):
    w1t, w2t, w3t, b_cat = params
    cdt = w1t.dtype
    h1_dim, h2_dim = w1t.shape[1], w2t.shape[1]
    b1 = b_cat[:, :h1_dim]
    b2 = b_cat[:, h1_dim:h1_dim + h2_dim]
    b3 = b_cat[:, h1_dim + h2_dim:]
    h1 = jnp.maximum(
        jnp.dot(x.astype(cdt), w1t, preferred_element_type=jnp.float32) + b1, 0.0)
    h2 = jnp.maximum(
        jnp.dot(h1.astype(cdt), w2t, preferred_element_type=jnp.float32) + b2, 0.0)
    emb = jnp.dot(h2.astype(cdt), w3t, preferred_element_type=jnp.float32) + b3
    norm = jnp.linalg.norm(emb, axis=1, keepdims=True)
    xn = emb / jnp.maximum(norm, 1e-12)
    wf = jnp.dot(xn, arc_wt, preferred_element_type=jnp.float32)
    diag = jnp.take_along_axis(wf, labels[:, None], axis=1)[:, 0]
    t = jnp.clip(diag, -1.0 + eps, 1.0 - eps)
    numerator = s * jnp.cos(jnp.arccos(t) + m)
    oh = jax.nn.one_hot(labels, wf.shape[1], dtype=jnp.float32)
    excl_sum = jnp.sum(jnp.exp(s * wf) * (1.0 - oh), axis=1)
    L = numerator - jnp.log(jnp.exp(numerator) + excl_sum)
    return -jnp.mean(L)


if __name__ == "__main__":
    # Small shapes consistent with the module.
    batch = 8
    in_feature = 10
    arc_option = {"out_features": 16, "scaling_facor": 30.0, "margin": 0.4}

    key = jax.random.PRNGKey(0)
    k_param, k_x, k_lbl = jax.random.split(key, 3)

    params, arc_wt = init_params(k_param, in_feature, arc_option["out_features"])
    x = jax.random.normal(k_x, (batch, in_feature), jnp.float32)
    labels = jax.random.randint(k_lbl, (batch,), 0, arc_option["out_features"], jnp.int32)

    # Forward with labels -> scalar arcface loss (fully fused single kernel).
    loss = testmodel_forward(
        x, params, arc_wt, labels=labels,
        s=arc_option["scaling_facor"], m=arc_option["margin"],
    )
    loss = jax.block_until_ready(loss)

    # Embedding path (embed=True).
    emb = testmodel_forward(
        x, params, arc_wt, embed=True,
        s=arc_option["scaling_facor"], m=arc_option["margin"],
    )
    emb = jax.block_until_ready(emb)

    # Sanity checks against a pure-JAX reference (same mixed-precision policy).
    ref_loss = _ref_forward_loss(
        x, params, arc_wt, labels,
        s=arc_option["scaling_facor"], m=arc_option["margin"],
    )
    assert emb.shape == (batch, arc_option["out_features"] * 2)
    assert loss.shape == ()
    assert bool(jnp.isfinite(loss))
    assert bool(jnp.allclose(loss, ref_loss, rtol=1e-2, atol=1e-2)), (loss, ref_loss)
    print("KERNEL_OK")
</pallas_src>

<mosaic_0001>
module attributes {stable_mosaic.version = 11 : i64} {
  func.func @fused_arcface_kernel(%arg0: memref<8x10xf32, #tpu.memory_space<vmem>>, %arg1: memref<10x512xbf16, #tpu.memory_space<vmem>>, %arg2: memref<512x256xbf16, #tpu.memory_space<vmem>>, %arg3: memref<256x32xbf16, #tpu.memory_space<vmem>>, %arg4: memref<1x800xf32, #tpu.memory_space<vmem>>, %arg5: memref<32x16xf32, #tpu.memory_space<vmem>>, %arg6: memref<8xi32, #tpu.memory_space<smem>>, %arg7: memref<1x1xf32, #tpu.memory_space<smem>>) attributes {dimension_semantics = [], scalar_prefetch = 0 : i64, scratch_operands = 0 : i64, tpu.core_type = #tpu.core_type<tc>} {
    %c0 = arith.constant 0 : index
    %c0_0 = arith.constant 0 : index
    %0 = vector.load %arg4[%c0, %c0_0] : memref<1x800xf32, #tpu.memory_space<vmem>>, vector<1x512xf32>
    %c0_1 = arith.constant 0 : index
    %c512 = arith.constant 512 : index
    %1 = vector.load %arg4[%c0_1, %c512] : memref<1x800xf32, #tpu.memory_space<vmem>>, vector<1x256xf32>
    %c0_2 = arith.constant 0 : index
    %c768 = arith.constant 768 : index
    %2 = vector.load %arg4[%c0_2, %c768] : memref<1x800xf32, #tpu.memory_space<vmem>>, vector<1x32xf32>
    %c0_3 = arith.constant 0 : index
    %c0_4 = arith.constant 0 : index
    %3 = vector.load %arg0[%c0_3, %c0_4] : memref<8x10xf32, #tpu.memory_space<vmem>>, vector<8x10xf32>
    %4 = arith.truncf %3 : vector<8x10xf32> to vector<8x10xbf16>
    %c0_5 = arith.constant 0 : index
    %c0_6 = arith.constant 0 : index
    %5 = vector.load %arg1[%c0_5, %c0_6] : memref<10x512xbf16, #tpu.memory_space<vmem>>, vector<10x512xbf16>
    %cst = arith.constant dense<0.000000e+00> : vector<8x512xf32>
    %6 = tpu.matmul %4, %5, %cst {dimension_numbers = #tpu.dot_dimension_numbers<[1], [0], [0], [1], [0, 0, 1, 1], [], []>} : vector<8x10xbf16>, vector<10x512xbf16>, vector<8x512xf32> -> vector<8x512xf32>
    %7 = vector.broadcast %0 : vector<1x512xf32> to vector<8x512xf32>
    %8 = arith.addf %6, %7 : vector<8x512xf32>
    %cst_7 = arith.constant 0.000000e+00 : f32
    %9 = vector.broadcast %cst_7 : f32 to vector<8x512xf32>
    %10 = arith.maximumf %8, %9 : vector<8x512xf32>
    %11 = arith.truncf %10 : vector<8x512xf32> to vector<8x512xbf16>
    %c0_8 = arith.constant 0 : index
    %c0_9 = arith.constant 0 : index
    %12 = vector.load %arg2[%c0_8, %c0_9] : memref<512x256xbf16, #tpu.memory_space<vmem>>, vector<512x256xbf16>
    %cst_10 = arith.constant dense<0.000000e+00> : vector<8x256xf32>
    %13 = tpu.matmul %11, %12, %cst_10 {dimension_numbers = #tpu.dot_dimension_numbers<[1], [0], [0], [1], [0, 0, 1, 1], [], []>} : vector<8x512xbf16>, vector<512x256xbf16>, vector<8x256xf32> -> vector<8x256xf32>
    %14 = vector.broadcast %1 : vector<1x256xf32> to vector<8x256xf32>
    %15 = arith.addf %13, %14 : vector<8x256xf32>
    %cst_11 = arith.constant 0.000000e+00 : f32
    %16 = vector.broadcast %cst_11 : f32 to vector<8x256xf32>
    %17 = arith.maximumf %15, %16 : vector<8x256xf32>
    %18 = arith.truncf %17 : vector<8x256xf32> to vector<8x256xbf16>
    %c0_12 = arith.constant 0 : index
    %c0_13 = arith.constant 0 : index
    %19 = vector.load %arg3[%c0_12, %c0_13] : memref<256x32xbf16, #tpu.memory_space<vmem>>, vector<256x32xbf16>
    %cst_14 = arith.constant dense<0.000000e+00> : vector<8x32xf32>
    %20 = tpu.matmul %18, %19, %cst_14 {dimension_numbers = #tpu.dot_dimension_numbers<[1], [0], [0], [1], [0, 0, 1, 1], [], []>} : vector<8x256xbf16>, vector<256x32xbf16>, vector<8x32xf32> -> vector<8x32xf32>
    %21 = vector.broadcast %2 : vector<1x32xf32> to vector<8x32xf32>
    %22 = arith.addf %20, %21 : vector<8x32xf32>
    %23 = arith.mulf %22, %22 : vector<8x32xf32>
    %cst_15 = arith.constant dense<0.000000e+00> : vector<8xf32>
    %24 = vector.multi_reduction <add>, %23, %cst_15 [1] : vector<8x32xf32> to vector<8xf32>
    %25 = vector.shape_cast %24 : vector<8xf32> to vector<8x1xf32>
    %cst_16 = arith.constant 1.000000e-24 : f32
    %26 = vector.broadcast %cst_16 : f32 to vector<8x1xf32>
    %27 = arith.maximumf %25, %26 : vector<8x1xf32>
    %28 = math.rsqrt %27 : vector<8x1xf32>
    %29 = vector.broadcast %28 : vector<8x1xf32> to vector<8x32xf32>
    %30 = arith.mulf %22, %29 : vector<8x32xf32>
    %c0_17 = arith.constant 0 : index
    %c0_18 = arith.constant 0 : index
    %31 = vector.load %arg5[%c0_17, %c0_18] : memref<32x16xf32, #tpu.memory_space<vmem>>, vector<32x16xf32>
    %cst_19 = arith.constant dense<0.000000e+00> : vector<8x16xf32>
    %32 = tpu.matmul %30, %31, %cst_19 {dimension_numbers = #tpu.dot_dimension_numbers<[1], [0], [0], [1], [0, 0, 1, 1], [], []>} : vector<8x32xf32>, vector<32x16xf32>, vector<8x16xf32> -> vector<8x16xf32>
    %33 = tpu.iota {dimensions = array<i32: 1>} : vector<8x16xi32>
    %34 = tpu.iota {dimensions = array<i32: 0>} : vector<8x16xi32>
    %c0_i32 = arith.constant 0 : i32
    %35 = vector.broadcast %c0_i32 : i32 to vector<8x16xi32>
    %c0_i32_20 = arith.constant 0 : i32
    %36 = vector.broadcast %c0_i32_20 : i32 to vector<8x16xi32>
    %37 = arith.cmpi eq, %34, %36 : vector<8x16xi32>
    %c0_21 = arith.constant 0 : index
    %38 = memref.load %arg6[%c0_21] : memref<8xi32, #tpu.memory_space<smem>>
    %39 = vector.broadcast %38 : i32 to vector<8x16xi32>
    %40 = arith.select %37, %39, %35 : vector<8x16xi1>, vector<8x16xi32>
    %c1_i32 = arith.constant 1 : i32
    %41 = vector.broadcast %c1_i32 : i32 to vector<8x16xi32>
    %42 = arith.cmpi eq, %34, %41 : vector<8x16xi32>
    %c1 = arith.constant 1 : index
    %43 = memref.load %arg6[%c1] : memref<8xi32, #tpu.memory_space<smem>>
    %44 = vector.broadcast %43 : i32 to vector<8x16xi32>
    %45 = arith.select %42, %44, %40 : vector<8x16xi1>, vector<8x16xi32>
    %c2_i32 = arith.constant 2 : i32
    %46 = vector.broadcast %c2_i32 : i32 to vector<8x16xi32>
    %47 = arith.cmpi eq, %34, %46 : vector<8x16xi32>
    %c2 = arith.constant 2 : index
    %48 = memref.load %arg6[%c2] : memref<8xi32, #tpu.memory_space<smem>>
    %49 = vector.broadcast %48 : i32 to vector<8x16xi32>
    %50 = arith.select %47, %49, %45 : vector<8x16xi1>, vector<8x16xi32>
    %c3_i32 = arith.constant 3 : i32
    %51 = vector.broadcast %c3_i32 : i32 to vector<8x16xi32>
    %52 = arith.cmpi eq, %34, %51 : vector<8x16xi32>
    %c3 = arith.constant 3 : index
    %53 = memref.load %arg6[%c3] : memref<8xi32, #tpu.memory_space<smem>>
    %54 = vector.broadcast %53 : i32 to vector<8x16xi32>
    %55 = arith.select %52, %54, %50 : vector<8x16xi1>, vector<8x16xi32>
    %c4_i32 = arith.constant 4 : i32
    %56 = vector.broadcast %c4_i32 : i32 to vector<8x16xi32>
    %57 = arith.cmpi eq, %34, %56 : vector<8x16xi32>
    %c4 = arith.constant 4 : index
    %58 = memref.load %arg6[%c4] : memref<8xi32, #tpu.memory_space<smem>>
    %59 = vector.broadcast %58 : i32 to vector<8x16xi32>
    %60 = arith.select %57, %59, %55 : vector<8x16xi1>, vector<8x16xi32>
    %c5_i32 = arith.constant 5 : i32
    %61 = vector.broadcast %c5_i32 : i32 to vector<8x16xi32>
    %62 = arith.cmpi eq, %34, %61 : vector<8x16xi32>
    %c5 = arith.constant 5 : index
    %63 = memref.load %arg6[%c5] : memref<8xi32, #tpu.memory_space<smem>>
    %64 = vector.broadcast %63 : i32 to vector<8x16xi32>
    %65 = arith.select %62, %64, %60 : vector<8x16xi1>, vector<8x16xi32>
    %c6_i32 = arith.constant 6 : i32
    %66 = vector.broadcast %c6_i32 : i32 to vector<8x16xi32>
    %67 = arith.cmpi eq, %34, %66 : vector<8x16xi32>
    %c6 = arith.constant 6 : index
    %68 = memref.load %arg6[%c6] : memref<8xi32, #tpu.memory_space<smem>>
    %69 = vector.broadcast %68 : i32 to vector<8x16xi32>
    %70 = arith.select %67, %69, %65 : vector<8x16xi1>, vector<8x16xi32>
    %c7_i32 = arith.constant 7 : i32
    %71 = vector.broadcast %c7_i32 : i32 to vector<8x16xi32>
    %72 = arith.cmpi eq, %34, %71 : vector<8x16xi32>
    %c7 = arith.constant 7 : index
    %73 = memref.load %arg6[%c7] : memref<8xi32, #tpu.memory_space<smem>>
    %74 = vector.broadcast %73 : i32 to vector<8x16xi32>
    %75 = arith.select %72, %74, %70 : vector<8x16xi1>, vector<8x16xi32>
    %76 = arith.cmpi eq, %33, %75 : vector<8x16xi32>
    %cst_22 = arith.constant 0.000000e+00 : f32
    %77 = vector.broadcast %cst_22 : f32 to vector<8x16xf32>
    %78 = arith.select %76, %32, %77 : vector<8x16xi1>, vector<8x16xf32>
    %cst_23 = arith.constant dense<0.000000e+00> : vector<8xf32>
    %79 = vector.multi_reduction <add>, %78, %cst_23 [1] : vector<8x16xf32> to vector<8xf32>
    %80 = vector.shape_cast %79 : vector<8xf32> to vector<8x1xf32>
    %cst_24 = arith.constant -0.99999988 : f32
    %cst_25 = arith.constant 0.99999988 : f32
    %81 = vector.broadcast %cst_24 : f32 to vector<8x1xf32>
    %82 = arith.maximumf %81, %80 : vector<8x1xf32>
    %83 = vector.broadcast %cst_25 : f32 to vector<8x1xf32>
    %84 = arith.minimumf %83, %82 : vector<8x1xf32>
    %cst_26 = arith.constant 0.921060979 : f32
    %85 = vector.broadcast %cst_26 : f32 to vector<8x1xf32>
    %86 = arith.mulf %84, %85 : vector<8x1xf32>
    %87 = arith.mulf %84, %84 : vector<8x1xf32>
    %cst_27 = arith.constant 1.000000e+00 : f32
    %88 = vector.broadcast %cst_27 : f32 to vector<8x1xf32>
    %89 = arith.subf %88, %87 : vector<8x1xf32>
    %90 = math.sqrt %89 : vector<8x1xf32>
    %cst_28 = arith.constant 0.389418334 : f32
    %91 = vector.broadcast %cst_28 : f32 to vector<8x1xf32>
    %92 = arith.mulf %90, %91 : vector<8x1xf32>
    %93 = arith.subf %86, %92 : vector<8x1xf32>
    %cst_29 = arith.constant 3.000000e+01 : f32
    %94 = vector.broadcast %cst_29 : f32 to vector<8x1xf32>
    %95 = arith.mulf %94, %93 : vector<8x1xf32>
    %cst_30 = arith.constant 3.000000e+01 : f32
    %96 = vector.broadcast %cst_30 : f32 to vector<8x16xf32>
    %97 = arith.mulf %96, %32 : vector<8x16xf32>
    %98 = math.exp %97 : vector<8x16xf32>
    %cst_31 = arith.constant dense<0.000000e+00> : vector<8xf32>
    %99 = vector.multi_reduction <add>, %98, %cst_31 [1] : vector<8x16xf32> to vector<8xf32>
    %100 = vector.shape_cast %99 : vector<8xf32> to vector<8x1xf32>
    %cst_32 = arith.constant 3.000000e+01 : f32
    %101 = vector.broadcast %cst_32 : f32 to vector<8x1xf32>
    %102 = arith.mulf %101, %80 : vector<8x1xf32>
    %103 = math.exp %102 : vector<8x1xf32>
    %104 = arith.subf %100, %103 : vector<8x1xf32>
    %105 = math.exp %95 : vector<8x1xf32>
    %106 = arith.addf %105, %104 : vector<8x1xf32>
    %107 = math.log %106 : vector<8x1xf32>
    %108 = arith.subf %95, %107 : vector<8x1xf32>
    %109 = vector.shape_cast %108 : vector<8x1xf32> to vector<1x8x1xf32>
    %cst_33 = arith.constant dense<0.000000e+00> : vector<1xf32>
    %110 = vector.multi_reduction <add>, %109, %cst_33 [1, 2] : vector<1x8x1xf32> to vector<1xf32>
    %111 = vector.shape_cast %110 : vector<1xf32> to vector<1x1x1xf32>
    %112 = vector.extract %111[0, 0, 0] : f32 from vector<1x1x1xf32>
    %cst_34 = arith.constant -1.250000e-01 : f32
    %113 = arith.mulf %112, %cst_34 : f32
    %c0_35 = arith.constant 0 : index
    %c0_36 = arith.constant 0 : index
    %114 = memref.load %arg7[%c0_35, %c0_36] : memref<1x1xf32, #tpu.memory_space<smem>>
    memref.store %113, %arg7[%c0_35, %c0_36] : memref<1x1xf32, #tpu.memory_space<smem>>
    return
  }
}

</mosaic_0001>

<bundles_post_ra>
// kernel: tpu_custom_call.1
= control target key start
LH: loop header
LB: loop body
LE: loop exit
PB: predicated region body
PF: predicated region fallthrough
CT: control target
= control target key end

     0   :  { %12 = vsyncpa [#allocation3], 0  ;;  %s1579_s0 = inlined_call_operand.vmem [shape: f32[8,10], index: 0, kind: input, shape index: {}]   ;;  %s1580_s1 = inlined_call_operand.vmem [shape: bf16[10,512], index: 1, kind: input, shape index: {}]   ;;  %s1581_s2 = inlined_call_operand.hbm [shape: bf16[512,256], index: 2, kind: input, shape index: {}]   ;;  %s1582_s3 = inlined_call_operand.vmem [shape: bf16[256,32], index: 3, kind: input, shape index: {}]   ;;  %s1583_s4 = inlined_call_operand.vmem [shape: f32[1,800], index: 4, kind: input, shape index: {}]   ;;  %s1584_s5 = inlined_call_operand.vmem [shape: f32[32,16], index: 5, kind: input, shape index: {}]   ;;  %s1585_s6 = inlined_call_operand.vmem [shape: s32[8], index: 6, kind: input, shape index: {}]   ;;  %s1586_s7 = inlined_call_operand.hbm [shape: f32[1,1], index: 7, kind: output, shape index: {}]  }
   0x1   :  { %13 = vsyncpa [#allocation5], 0 }
   0x2   :  { %14 = vsyncpa [#allocation4], 0  ;;  %s1387_s24 = smov [#allocation2]   ;;  %s43_s28 = sshll.u32 %s1585_s6, 4  ;;  %s44_s28 = int_to_ptr.vmem [resolvable:$true] %s43_s28 }
   0x3   :  { %s24_s25 = sshll.u32 %s1387_s24, 4  ;;  %s1337_s8 = scalar_lea.hbm %s1581_s2, 8192  ;;  %s25_s25 = int_to_ptr.vmem [resolvable:$true] %s24_s25 }
   0x4   :  { %p1338_p0 = scmp.ne.s32.totalorder %s1581_s2, %s1337_s8  ;;  %p1341_p1 = scmp.lt.u32.totalorder %s1337_s8, %s1581_s2 }
   0x6   :  { %p1343_p2 = pnand %p1341_p1, %p1338_p0 }
   0x8   :  { %1346 = shalt.err (!%p1343_p2)
}
   0x9   :  { %s1347_s13 = scalar_lea.vmem %s25_s25, 8192  ;;  %p1352_p4 = scmp.lt.s32.totalorder %s25_s25, %s25_s25 }
   0xa   :  { %p1348_p3 = scmp.ne.s32.totalorder %s25_s25, %s1347_s13  ;;  %p1353_p5 = scmp.lt.s32.totalorder %s1347_s13, %s1347_s13 }
   0xc   :  { %p1354_p6 = por %p1353_p5, %p1352_p4 }
   0xe   :  { %p1355_p7 = pnand %p1354_p6, %p1348_p3 }
  0x10   :  { %1358 = shalt.err (!%p1355_p7)
}
  0x11   :  { %s1388_s6 = smov 128   ;;  %s1389_s14 = smov 8  }
  0x12   :  { %30 = dma.hbm_to_vmem [thread:$0]  %s1581_s2, 8192, %s25_s25, [#allocation3], %s1388_s6, %s1388_s6, %s1389_s14  }
  0x13   :  { %s1359_s17 = scalar_lea.vmem %s44_s28, 16  ;;  %p1364_p9 = scmp.lt.s32.totalorder %s44_s28, %s44_s28 }
  0x14   :  { %p1360_p8 = scmp.ne.s32.totalorder %s44_s28, %s1359_s17  ;;  %p1365_p10 = scmp.lt.s32.totalorder %s1359_s17, %s1359_s17 }
  0x16   :  { %p1366_p11 = por %p1365_p10, %p1364_p9 }
  0x18   :  { %p1367_p12 = pnand %p1366_p11, %p1360_p8 }
  0x1a   :  { %1370 = shalt.err (!%p1367_p12)
}
  0x1b   :  { %s1390_s18 = smov [#allocation6]  }
  0x1c   :  { %46 = dma.vmem_to_smem %s44_s28, 16, %s1390_s18, [#allocation5]  }
  0x1d   :  { %1381 = dma.done.wait [#allocation3], 8192  }
  0x1e   :  { %1382 = vsyncadd [#allocation3], 4294959104 }
  0x1f   :  { %1383 = dma.done.wait [#allocation5], 16  }
  0x20   :  { %1384 = vsyncadd [#allocation5], 4294967280 }
  0x21   :  { %53 = sfence }
  0x22   :  { %v1207_v0 = vld [vmem:[%s1580_s1 + $0x4] ss:$16 sps:$4 sm:$0x1f]   ;;  %vm105_vm0 = vcmask 1044480   ;;  %v1391_v3 = vmov 0   ;;  %vm101_vm1 = vcmask 80896  }
  0x23   :  { %v1209_v1 = vld [vmem:[%s1580_s1] ss:$16 sps:$4 sm:$0x1f]   ;;  %1054 = vmatprep.subr.msk.bf16.mxu0 %vm105_vm0, %v1207_v0  ;;  %150 = vmatprep.mubr.bf16.mxu0 %v1391_v3  ;;  %v1210_v6 = vld [vmem:[%s1580_s1 + $0xc] ss:$16 sps:$4 sm:$0x1f]  }
  0x24   :  { %v58_v2 = vld [vmem:[%s1579_s0] sm:$0xff]  ;;  %v107_v4 = vsel %vm105_vm0, %v1209_v1, 0  ;;  %v1212_v7 = vld [vmem:[%s1580_s1 + $0x8] ss:$16 sps:$4 sm:$0x1f]   ;;  %vm864_vm2 = vcmask 261120  }
  0x25   :  { %v59_v5 = vpack.c.bf16 %v58_v2, %v58_v2  ;;  %119 = vmatpush1.bf16.msra.mxu0 %v107_v4  ;;  %v1213_v8 = vld [vmem:[#allocation2 + $0x4] ss:$8 sps:$4 sm:$0xff]   ;;  %v1215_v9 = vld [vmem:[#allocation2] ss:$8 sps:$4 sm:$0xff]   ;;  %v1216_v10 = vld [vmem:[#allocation2 + $0x14] ss:$8 sps:$4 sm:$0xff]  }
  0x26   :  { %1056 = vmatprep.subr.msk.bf16.mxu0 %vm105_vm0, %v1210_v6  ;;  %v113_v11 = vsel %vm105_vm0, %v1212_v7, 0  ;;  %603 = vmatprep.subr.bf16.mxu1 %v1213_v8  ;;  %v1218_v12 = vld [vmem:[#allocation2 + $0x10] ss:$8 sps:$4 sm:$0xff]   ;;  %v1219_v13 = vld [vmem:[#allocation2 + $0x24] ss:$8 sps:$4 sm:$0xff]   ;;  %vm1393_vm3 = vmmov 0  }
  0x27   :  { %604 = vmatpush1.bf16.msra.mxu1 %v1215_v9  ;;  %v1223_v14 = vld [vmem:[#allocation2 + $0x104] ss:$8 sps:$4 sm:$0xff]   ;;  %v1221_v15 = vld [vmem:[#allocation2 + $0x100] ss:$8 sps:$4 sm:$0xff]   ;;  %v1225_v17 = vld [vmem:[#allocation2 + $0x34] ss:$8 sps:$4 sm:$0xff]  }
  0x28   :  { %1055 = vmatmul.mubr.msk.bf16.vlgmr.msra.gmra.mrb[0].mxu0 %vm101_vm1, %v59_v5  ;;  %605 = vmatprep.subr.bf16.mxu1 %v1216_v10  ;;  %v1224_v16 = vld [vmem:[#allocation2 + $0x20] ss:$8 sps:$4 sm:$0xff]   ;;  %v1229_v18 = vld [vmem:[#allocation2 + $0x114] ss:$8 sps:$4 sm:$0xff]   ;;  %v1230_v19 = vld [vmem:[#allocation2 + $0x30] ss:$8 sps:$4 sm:$0xff]   ;;  %v65_v10 = vlaneseq }
  0x29   :  { %160 = vmatpush1.bf16.msra.mxu0 %v113_v11  ;;  %191 = vmatprep.mubr.bf16.mxu0 %v1391_v3  ;;  %v1227_v20 = vld [vmem:[#allocation2 + $0x110] ss:$8 sps:$4 sm:$0xff]   ;;  %v1231_v21 = vld [vmem:[#allocation2 + $0x44] ss:$8 sps:$4 sm:$0xff]   ;;  %v1233_v23 = vld [vmem:[#allocation2 + $0x120] ss:$8 sps:$4 sm:$0xff]  }
  0x2a   :  { %644 = vmatprep.subr.bf16.mxu0 %v1223_v14  ;;  %v1235_v22 = vld [vmem:[#allocation2 + $0x124] ss:$8 sps:$4 sm:$0xff]   ;;  %v1236_v24 = vld [vmem:[#allocation2 + $0x40] ss:$8 sps:$4 sm:$0xff]   ;;  %v1237_v25 = vld [vmem:[#allocation2 + $0x54] ss:$8 sps:$4 sm:$0xff]  }
  0x2b   :  { %606 = vmatpush1.bf16.msra.mxu1 %v1218_v12  ;;  %v1241_v26 = vld [vmem:[#allocation2 + $0x134] ss:$8 sps:$4 sm:$0xff]   ;;  %v1242_v27 = vld [vmem:[#allocation2 + $0x50] ss:$8 sps:$4 sm:$0xff]   ;;  %v1243_v29 = vld [vmem:[#allocation2 + $0x64] ss:$8 sps:$4 sm:$0xff]  }
  0x2c   :  { %607 = vmatprep.subr.bf16.mxu1 %v1219_v13  ;;  %v1239_v28 = vld [vmem:[#allocation2 + $0x130] ss:$8 sps:$4 sm:$0xff]   ;;  %v1247_v30 = vld [vmem:[#allocation2 + $0x144] ss:$8 sps:$4 sm:$0xff]   ;;  %v1245_v31 = vld [vmem:[#allocation2 + $0x140] ss:$8 sps:$4 sm:$0xff]  }
  0x2d   :  { %v1248_v32 = vld [vmem:[#allocation2 + $0x60] ss:$8 sps:$4 sm:$0xff]   ;;  %v1249_v33 = vld [vmem:[#allocation2 + $0x74] ss:$8 sps:$4 sm:$0xff]   ;;  %v1254_v35 = vld [vmem:[#allocation2 + $0x70] ss:$8 sps:$4 sm:$0xff]  }
  0x2e   :  { %v1253_v34 = vld [vmem:[#allocation2 + $0x154] ss:$8 sps:$4 sm:$0xff]   ;;  %v1251_v36 = vld [vmem:[#allocation2 + $0x150] ss:$8 sps:$4 sm:$0xff]   ;;  %v1255_v37 = vld [vmem:[#allocation2 + $0x84] ss:$8 sps:$4 sm:$0xff]  }
  0x2f   :  { %608 = vmatpush1.bf16.msra.mxu1 %v1224_v16  ;;  %v1259_v38 = vld [vmem:[#allocation2 + $0x164] ss:$8 sps:$4 sm:$0xff]   ;;  %v1257_v39 = vld [vmem:[#allocation2 + $0x160] ss:$8 sps:$4 sm:$0xff]   ;;  %v1261_v41 = vld [vmem:[#allocation2 + $0x94] ss:$8 sps:$4 sm:$0xff]  }
  0x30   :  { %1057 = vmatmul.mubr.msk.bf16.vlgmr.msra.gmra.mrb[4].mxu0 %vm101_vm1, %v59_v5  ;;  %609 = vmatprep.subr.bf16.mxu1 %v1225_v17  ;;  %v1260_v40 = vld [vmem:[#allocation2 + $0x80] ss:$8 sps:$4 sm:$0xff]   ;;  %v1265_v42 = vld [vmem:[#allocation2 + $0x174] ss:$8 sps:$4 sm:$0xff]   ;;  %v1266_v43 = vld [vmem:[#allocation2 + $0x90] ss:$8 sps:$4 sm:$0xff]  }
  0x31   :  { %645 = vmatpush1.bf16.msra.mxu0 %v1221_v15  ;;  %v1263_v44 = vld [vmem:[#allocation2 + $0x170] ss:$8 sps:$4 sm:$0xff]   ;;  %v1267_v45 = vld [vmem:[#allocation2 + $0xa4] ss:$8 sps:$4 sm:$0xff]   ;;  %v1272_v47 = vld [vmem:[#allocation2 + $0xa0] ss:$8 sps:$4 sm:$0xff]  }
  0x32   :  { %646 = vmatprep.subr.bf16.mxu0 %v1229_v18  ;;  %v1271_v46 = vld [vmem:[#allocation2 + $0x184] ss:$8 sps:$4 sm:$0xff]   ;;  %v1269_v48 = vld [vmem:[#allocation2 + $0x180] ss:$8 sps:$4 sm:$0xff]   ;;  %v1273_v49 = vld [vmem:[#allocation2 + $0xb4] ss:$8 sps:$4 sm:$0xff]  }
  0x33   :  { %610 = vmatpush1.bf16.msra.mxu1 %v1230_v19  ;;  %v1277_v50 = vld [vmem:[#allocation2 + $0x194] ss:$8 sps:$4 sm:$0xff]   ;;  %v1278_v51 = vld [vmem:[#allocation2 + $0xb0] ss:$8 sps:$4 sm:$0xff]   ;;  %v1279_v53 = vld [vmem:[#allocation2 + $0xc4] ss:$8 sps:$4 sm:$0xff]  }
  0x34   :  { %611 = vmatprep.subr.bf16.mxu1 %v1231_v21  ;;  %v1275_v52 = vld [vmem:[#allocation2 + $0x190] ss:$8 sps:$4 sm:$0xff]   ;;  %v1283_v54 = vld [vmem:[#allocation2 + $0x1a4] ss:$8 sps:$4 sm:$0xff]   ;;  %v1284_v55 = vld [vmem:[#allocation2 + $0xc0] ss:$8 sps:$4 sm:$0xff]  }
  0x35   :  { %647 = vmatpush1.bf16.msra.mxu0 %v1227_v20  ;;  %v1281_v56 = vld [vmem:[#allocation2 + $0x1a0] ss:$8 sps:$4 sm:$0xff]   ;;  %v1285_v57 = vld [vmem:[#allocation2 + $0xd4] ss:$8 sps:$4 sm:$0xff]   ;;  %v1290_v59 = vld [vmem:[#allocation2 + $0xd0] ss:$8 sps:$4 sm:$0xff]  }
  0x36   :  { %648 = vmatprep.subr.bf16.mxu0 %v1235_v22  ;;  %v1289_v58 = vld [vmem:[#allocation2 + $0x1b4] ss:$8 sps:$4 sm:$0xff]   ;;  %v1287_v60 = vld [vmem:[#allocation2 + $0x1b0] ss:$8 sps:$4 sm:$0xff]   ;;  %v1291_v61 = vld [vmem:[#allocation2 + $0xe4] ss:$8 sps:$4 sm:$0xff]  }
  0x37   :  { %612 = vmatpush1.bf16.msra.mxu1 %v1236_v24  ;;  %v1295_v62 = vld [vmem:[#allocation2 + $0x1c4] ss:$8 sps:$4 sm:$0xff]   ;;  %v1293_v63 = vld [vmem:[#allocation2 + $0x1c0] ss:$8 sps:$4 sm:$0xff]   ;;  %v1297_v1 = vld [vmem:[#allocation2 + $0xf4] ss:$8 sps:$4 sm:$0xff]  }
  0x38   :  { %613 = vmatprep.subr.bf16.mxu1 %v1237_v25  ;;  %v1296_v0 = vld [vmem:[#allocation2 + $0xe0] ss:$8 sps:$4 sm:$0xff]   ;;  %v1301_v2 = vld [vmem:[#allocation2 + $0x1d4] ss:$8 sps:$4 sm:$0xff]   ;;  %v1299_v3 = vld [vmem:[#allocation2 + $0x1d0] ss:$8 sps:$4 sm:$0xff]  }
  0x39   :  { %649 = vmatpush1.bf16.msra.mxu0 %v1233_v23  ;;  %v1302_v4 = vld [vmem:[#allocation2 + $0xf0] ss:$8 sps:$4 sm:$0xff]   ;;  %v1305_v5 = vld [vmem:[#allocation2 + $0x1e4] ss:$8 sps:$4 sm:$0xff]   ;;  %v1303_v6 = vld [vmem:[#allocation2 + $0x1e0] ss:$8 sps:$4 sm:$0xff]  }
  0x3a   :  { %650 = vmatprep.subr.bf16.mxu0 %v1241_v26  ;;  %v1308_v7 = vld [vmem:[#allocation2 + $0x1f4] ss:$8 sps:$4 sm:$0xff]   ;;  %v1306_v8 = vld [vmem:[#allocation2 + $0x1f0] ss:$8 sps:$4 sm:$0xff]   ;;  %v1309_v9 = vld [vmem:[%s1582_s3 + $0x40] sm:$0xff]   ;;  %v1476_v11 = vshrl.u32 %v65_v10, 7 }
  0x3b   :  { %614 = vmatpush1.bf16.msra.mxu1 %v1242_v27  ;;  %v55_v13 = vld [vmem:[%s1583_s4] sm:$0xf]  ;;  %s953_s19 = sld [smem:[#allocation6]]  ;;  %s1140_s20 = sld [smem:[#allocation6 + $0x1]]  ;;  %vm986_vm13 = vcmask 130048   ;;  %vm1021_vm0 = vcmask 7168  }
  0x3c   :  { %615 = vmatprep.subr.bf16.mxu1 %v1243_v29  ;;  %v67_v12 = vsub.s32 0, %v1476_v11  ;;  %v71_v14 = vsub.s32 1, %v1476_v11  ;;  %v75_v20 = vsub.s32 2, %v1476_v11  ;;  %v79_v23 = vsub.s32 3, %v1476_v11  ;;  %s1141_s2 = sld [smem:[#allocation6 + $0x2]]  ;;  %s1143_s21 = sld [smem:[#allocation6 + $0x4]] }
  0x3d   :  { %651 = vmatpush1.bf16.msra.mxu0 %v1239_v28  ;;  %vm952_vm4 = vcmp.eq.s32.totalorder %v1476_v11, 0  ;;  %vm956_vm5 = vcmp.eq.s32.totalorder %v1476_v11, 1  ;;  %vm960_vm6 = vcmp.eq.s32.totalorder %v1476_v11, 2  ;;  %s1144_s22 = sld [smem:[#allocation6 + $0x5]]  ;;  %vm964_vm7 = vcmp.eq.s32.totalorder %v1476_v11, 3  ;;  %s1145_s23 = sld [smem:[#allocation6 + $0x6]] }
  0x3e   :  { %652 = vmatprep.subr.bf16.mxu0 %v1247_v30  ;;  %v68_v15 = vrot.slane %v55_v13, %v67_v12  ;;  %v72_v16 = vrot.slane %v55_v13, %v71_v14  ;;  %v76_v27 = vrot.slane %v55_v13, %v75_v20  ;;  %v80_v29 = vrot.slane %v55_v13, %v79_v23  ;;  %v1310_v30 = vld [vmem:[%s1582_s3] sm:$0xff]   ;;  %v872_v23 = vld [vmem:[%s1584_s5 + $0x8] sm:$0xff]  ;;  %s1146_s24 = sld [smem:[#allocation6 + $0x7]]  ;;  %s1371_s1 = scalar_lea.hbm %s1586_s7, 16 }
  0x3f   :  { %616 = vmatpush1.bf16.msra.mxu1 %v1248_v32  ;;  %v1311_v32 = vld [vmem:[%s1582_s3 + $0x48] sm:$0xff]   ;;  %vm968_vm8 = vcmp.eq.s32.totalorder %v1476_v11, 4  ;;  %vm972_vm9 = vcmp.eq.s32.totalorder %v1476_v11, 5  ;;  %vm976_vm10 = vcmp.eq.s32.totalorder %v1476_v11, 6  ;;  %vm980_vm11 = vcmp.eq.s32.totalorder %v1476_v11, 7  ;;  %p1372_p13 = scmp.ne.s32.totalorder %s1586_s7, %s1371_s1  ;;  %p1375_p0 = scmp.lt.u32.totalorder %s1371_s1, %s1586_s7 }
  0x40   :  { %617 = vmatprep.subr.bf16.mxu1 %v1249_v33 }
  0x41   :  { %653 = vmatpush1.bf16.msra.mxu0 %v1245_v31  ;;  %p1377_p1 = pnand %p1375_p0, %p1372_p13 }
  0x42   :  { %654 = vmatprep.subr.bf16.mxu0 %v1253_v34 }
  0x43   :  { %618 = vmatpush1.bf16.msra.mxu1 %v1254_v35 }
  0x44   :  { %619 = vmatprep.subr.bf16.mxu1 %v1255_v37 }
  0x45   :  { %655 = vmatpush1.bf16.msra.mxu0 %v1251_v36 }
  0x46   :  { %656 = vmatprep.subr.bf16.mxu0 %v1259_v38  ;;  %v1312_v38 = vld [vmem:[%s1582_s3 + $0x8] sm:$0xff]  }
  0x47   :  { %620 = vmatpush1.bf16.msra.mxu1 %v1260_v40 }
  0x48   :  { %621 = vmatprep.subr.bf16.mxu1 %v1261_v41  ;;  %v1313_v41 = vld [vmem:[%s1582_s3 + $0x50] sm:$0xff]  }
  0x49   :  { %657 = vmatpush1.bf16.msra.mxu0 %v1257_v39 }
  0x4a   :  { %658 = vmatprep.subr.bf16.mxu0 %v1265_v42 }
  0x4b   :  { %622 = vmatpush1.bf16.msra.mxu1 %v1266_v43 }
  0x4c   :  { %623 = vmatprep.subr.bf16.mxu1 %v1267_v45 }
  0x4d   :  { %659 = vmatpush1.bf16.msra.mxu0 %v1263_v44  ;;  %v1314_v44 = vld [vmem:[%s1582_s3 + $0x10] sm:$0xff]  }
  0x4e   :  { %660 = vmatprep.subr.bf16.mxu0 %v1271_v46  ;;  %v1315_v46 = vld [vmem:[%s1582_s3 + $0x58] sm:$0xff]  }
  0x4f   :  { %624 = vmatpush1.bf16.msra.mxu1 %v1272_v47  ;;  %v1316_v47 = vld [vmem:[%s1582_s3 + $0x18] sm:$0xff]  }
  0x50   :  { %625 = vmatprep.subr.bf16.mxu1 %v1273_v49  ;;  %v1318_v49 = vld [vmem:[%s1582_s3 + $0x20] sm:$0xff]  }
  0x51   :  { %661 = vmatpush1.bf16.msra.mxu0 %v1269_v48  ;;  %v1317_v48 = vld [vmem:[%s1582_s3 + $0x60] sm:$0xff]  }
  0x52   :  { %662 = vmatprep.subr.bf16.mxu0 %v1277_v50  ;;  %v1319_v50 = vld [vmem:[%s1582_s3 + $0x68] sm:$0xff]  }
  0x53   :  { %626 = vmatpush1.bf16.msra.mxu1 %v1278_v51  ;;  %v1320_v51 = vld [vmem:[%s1582_s3 + $0x28] sm:$0xff]  }
  0x54   :  { %627 = vmatprep.subr.bf16.mxu1 %v1279_v53  ;;  %v1322_v53 = vld [vmem:[%s1582_s3 + $0x30] sm:$0xff]  }
  0x55   :  { %663 = vmatpush1.bf16.msra.mxu0 %v1275_v52  ;;  %v1321_v52 = vld [vmem:[%s1582_s3 + $0x70] sm:$0xff]  }
  0x56   :  { %664 = vmatprep.subr.bf16.mxu0 %v1283_v54  ;;  %v1323_v54 = vld [vmem:[%s1582_s3 + $0x78] sm:$0xff]  }
  0x57   :  { %628 = vmatpush1.bf16.msra.mxu1 %v1284_v55  ;;  %v1324_v55 = vld [vmem:[%s1582_s3 + $0x38] sm:$0xff]  }
  0x58   :  { %629 = vmatprep.subr.bf16.mxu1 %v1285_v57 }
  0x59   :  { %665 = vmatpush1.bf16.msra.mxu0 %v1281_v56  ;;  %v56_v56 = vld [vmem:[%s1583_s4 + $0x4] sm:$0x3] }
  0x5a   :  { %666 = vmatprep.subr.bf16.mxu0 %v1289_v58 }
  0x5b   :  { %630 = vmatpush1.bf16.msra.mxu1 %v1290_v59 }
  0x5c   :  { %631 = vmatprep.subr.bf16.mxu1 %v1291_v61 }
  0x5d   :  { %667 = vmatpush1.bf16.msra.mxu0 %v1287_v60  ;;  %v276_v60 = vrot.slane %v56_v56, %v67_v12  ;;  %v1122_v12 = vld [vmem:[%s1583_s4 + $0x6] ss:$0 sm:$0xff] }
  0x5e   :  { %668 = vmatprep.subr.bf16.mxu0 %v1295_v62  ;;  %v280_v62 = vrot.slane %v56_v56, %v71_v14 }
  0x5f   :  { %632 = vmatpush1.bf16.msra.mxu1 %v1296_v0 }
  0x60   :  { %633 = vmatprep.subr.bf16.mxu1 %v1297_v1 }
  0x61   :  { %669 = vmatpush1.bf16.msra.mxu0 %v1293_v63 }
  0x62   :  { %670 = vmatprep.subr.bf16.mxu0 %v1301_v2 }
  0x63   :  { %634 = vmatpush1.bf16.msra.mxu1 %v1302_v4 }
  0x64   :  { %1148 = vmatprep.subr.bf16.mxu1 %v1309_v9 }
  0x65   :  { %671 = vmatpush1.bf16.msra.mxu0 %v1299_v3 }
  0x66   :  { %672 = vmatprep.subr.bf16.mxu0 %v1305_v5 }
  0x69   :  { %673 = vmatpush1.bf16.msra.mxu0 %v1303_v6 }
  0x6a   :  { %674 = vmatprep.subr.bf16.mxu0 %v1308_v7 }
  0x6d   :  { %675 = vmatpush1.bf16.msra.mxu0 %v1306_v8 }
  0xfb   :  { %v152_v17 = vpop.f32.mrb[0].mxu0 }
  0xfc   :  { %v153_v18 = vadd.f32 %v152_v17, %v68_v15  ;;  %v154_v19 = vpop.f32.mrb[1].mxu0 }
  0xfd   :  { %v155_v21 = vadd.f32 %v154_v19, %v72_v16  ;;  %v156_v22 = vpop.f32.mrb[2].mxu0 }
  0xfe   :  { %v200_v24 = vmax.f32 %v153_v18, 0.0  ;;  %v157_v25 = vpop.f32.mrb[3].mxu0  ;;  %v871_v22 = vld [vmem:[%s1584_s5] sm:$0xff] }
  0xff   :  { %v201_v26 = vmax.f32 %v155_v21, 0.0  ;;  %v1392_v25 = vmov 0.0|0.0  }
 0x100   :  { %v204_v31 = vpack.c.bf16 %v200_v24, %v200_v24  ;;  %v873_v24 = vld [vmem:[%s1584_s5 + $0x10] sm:$0xff]  ;;  %1186 = vmatprep.subr.bf16.mxu0 %v1392_v25 }
 0x101   :  { %v205_v28 = vpack.c.bf16 %v201_v26, %v201_v26  ;;  %v1187_v26 = vpack.c.bf16 %v872_v23, %v871_v22 }
 0x103   :  { %v193_v33 = vpop.f32.mrb[4].mxu0  ;;  %635 = vmatprep.mubr.bf16.mxu1 %v205_v28  ;;  %v1394_v28 = vmov 0.0  }
 0x104   :  { %v194_v34 = vadd.f32 %v193_v33, %v76_v27  ;;  %v195_v35 = vpop.f32.mrb[5].mxu0  ;;  %636 = vmatmul.mubr.bf16.vlgmr.msra.gmra.mrb[0].mxu1 %v204_v31  ;;  %v874_v27 = vld [vmem:[%s1584_s5 + $0x18] sm:$0xff]  ;;  %s1142_s5 = sld [smem:[#allocation6 + $0x3]] }
 0x105   :  { %v196_v36 = vadd.f32 %v195_v35, %v80_v29  ;;  %v197_v37 = vpop.f32.mrb[6].mxu0  ;;  %1149 = vmatpush3.bf16.msra.mxu1 %v1310_v30  ;;  %v1190_v29 = vpack.c.bf16 %v874_v27, %v873_v24 }
 0x106   :  { %v202_v39 = vmax.f32 %v194_v34, 0.0  ;;  %v198_v40 = vpop.f32.mrb[7].mxu0  ;;  %1150 = vmatprep.subr.bf16.mxu1 %v1311_v32  ;;  %v954_v34 = vstv %s953_s19 }
 0x107   :  { %v203_v42 = vmax.f32 %v196_v36, 0.0  ;;  %v955_v35 = vsel %vm952_vm4, %v954_v34, 0  ;;  %v958_v36 = vstv %s1140_s20 }
 0x108   :  { %v206_v45 = vpack.c.bf16 %v202_v39, %v202_v39  ;;  %v959_v37 = vsel %vm956_vm5, %v958_v36, %v955_v35 }
 0x109   :  { %v207_v43 = vpack.c.bf16 %v203_v42, %v203_v42  ;;  %1151 = vmatpush3.bf16.msra.mxu1 %v1312_v38  ;;  %v962_v38 = vstv %s1141_s2  ;;  %v970_v42 = vstv %s1143_s21 }
 0x10a   :  { %1152 = vmatprep.subr.bf16.mxu1 %v1313_v41  ;;  %v963_v39 = vsel %vm960_vm6, %v962_v38, %v959_v37  ;;  %v966_v40 = vstv %s1142_s5 }
 0x10b   :  { %676 = vmatprep.mubr.bf16.mxu0 %v207_v43  ;;  %v967_v41 = vsel %vm964_vm7, %v966_v40, %v963_v39 }
 0x10c   :  { %677 = vmatmul.mubr.bf16.vlgmr.msra.gmra.mrb[8].mxu0 %v206_v45  ;;  %v971_v43 = vsel %vm968_vm8, %v970_v42, %v967_v41 }
 0x10d   :  { %1153 = vmatpush3.bf16.msra.mxu1 %v1314_v44  ;;  %1183 = vmatprep.mubr.msk.f32.mxu0 %vm1393_vm3, %v1394_v28  ;;  %v974_v44 = vstv %s1144_s22 }
 0x10e   :  { %1154 = vmatprep.subr.bf16.mxu1 %v1315_v46  ;;  %1188 = vmatpush3.bf16.msra.mxu0 %v1187_v26  ;;  %v975_v45 = vsel %vm972_vm9, %v974_v44, %v971_v43  ;;  %v978_v46 = vstv %s1145_s23 }
 0x10f   :  { %1189 = vmatprep.subr.bf16.mxu0 %v1392_v25 }
 0x111   :  { %1155 = vmatpush3.bf16.msra.mxu1 %v1316_v47  ;;  %v979_v47 = vsel %vm976_vm10, %v978_v46, %v975_v45 }
 0x112   :  { %1156 = vmatprep.subr.bf16.mxu1 %v1317_v48  ;;  %1191 = vmatpush3.bf16.msra.mxu0 %v1190_v29  ;;  %v982_v48 = vstv %s1146_s24 }
 0x115   :  { %1157 = vmatpush3.bf16.msra.mxu1 %v1318_v49  ;;  %v949_v49 = vand.u32 127, %v65_v10 }
 0x116   :  { %1158 = vmatprep.subr.bf16.mxu1 %v1319_v50  ;;  %v983_v50 = vsel %vm980_vm11, %v982_v48, %v979_v47 }
 0x117   :  { %vm984_vm12 = vcmp.eq.s32.totalorder %v949_v49, %v983_v50 }
 0x119   :  { %1159 = vmatpush3.bf16.msra.mxu1 %v1320_v51 }
 0x11a   :  { %1160 = vmatprep.subr.bf16.mxu1 %v1321_v52 }
 0x11d   :  { %1161 = vmatpush3.bf16.msra.mxu1 %v1322_v53 }
 0x11e   :  { %1162 = vmatprep.subr.bf16.mxu1 %v1323_v54 }
 0x121   :  { %1163 = vmatpush3.bf16.msra.mxu1 %v1324_v55 }
 0x1d7   :  { %v637_v57 = vpop.f32.mrb[0].mxu1 }
 0x1d8   :  { %v639_v58 = vpop.f32.mrb[1].mxu1  ;;  %v638_v63 = vadd.f32 %v637_v57, %v276_v60 }
 0x1d9   :  { %v641_v59 = vpop.f32.mrb[2].mxu1  ;;  %v640_v0 = vadd.f32 %v639_v58, %v280_v62 }
 0x1da   :  { %v642_v61 = vpop.f32.mrb[3].mxu1 }
 0x1df   :  { %v678_v1 = vpop.f32.mrb[8].mxu0 }
 0x1e0   :  { %v679_v2 = vadd.f32 %v678_v1, %v638_v63  ;;  %v680_v3 = vpop.f32.mrb[9].mxu0 }
 0x1e1   :  { %v681_v4 = vadd.f32 %v680_v3, %v640_v0  ;;  %v682_v5 = vpop.f32.mrb[10].mxu0 }
 0x1e2   :  { %v685_v6 = vmax.f32 %v679_v2, 0.0  ;;  %v683_v7 = vpop.f32.mrb[11].mxu0 }
 0x1e3   :  { %v686_v8 = vmax.f32 %v681_v4, 0.0 }
 0x1e4   :  { %v687_v13 = vpack.c.bf16 %v685_v6, %v685_v6 }
 0x1e5   :  { %v688_v9 = vpack.c.bf16 %v686_v8, %v686_v8 }
 0x1e7   :  { %855 = vmatprep.mubr.bf16.mxu1 %v688_v9 }
 0x1e8   :  { %856 = vmatmul.mubr.bf16.vlgmr.msra.gmra.mrb[4].mxu1 %v687_v13 }
 0x2bb   :  { %v1164_v15 = vpop.f32.mrb[4].mxu1 }
 0x2bc   :  { %v1165_v14 = vpop.f32.mrb[5].mxu1 }
 0x2bd   :  { %v1166_v16 = vadd.f32 %v1165_v14, %v1164_v15  ;;  %v1167_v17 = vpop.f32.mrb[6].mxu1 }
 0x2be   :  { %v1168_v18 = vpop.f32.mrb[7].mxu1 }
 0x2bf   :  { %v858_v19 = vadd.f32 %v1166_v16, %v1122_v12 }
 0x2c1   :  { %v863_v20 = vmul.f32 %v858_v19, %v858_v19 }
 0x2c3   :  { %v865_v21 = vsel %vm864_vm2, %v863_v20, 0.0 }
 0x2c4   :  { %866 = vadd.xlane.f32.xlu0 %v865_v21 }
 0x351   :  { %v867_v30 = vpop.xlane.xlu0 %866 }
 0x352   :  { %v868_v31 = vmax.f32 %v867_v30, 1e-24 }
 0x354   :  { %1325 = vrsqrt.f32 %v868_v31 }
 0x35e   :  { %v1326_v32 = vpop.eup %1325 }
 0x35f   :  { %v870_v33 = vmul.f32 %v1326_v32, %v858_v19 }
 0x361   :  { %1184 = vmatmul.mubr.msk.f32.vlgmr.msra.gmra.mrb[12].mxu0 %vm864_vm2, %v870_v33 }
 0x434   :  { %v944_v51 = vpop.f32.mrb[12].mxu0 }
 0x435   :  { %v1005_v52 = vmul.f32 30.0, %v944_v51  ;;  %v1185_v53 = vpop.f32.mrb[13].mxu0  ;;  %v985_v54 = vsel %vm984_vm12, %v944_v51, 0.0 }
 0x436   :  { %v987_v55 = vsel %vm986_vm13, %v985_v54, 0.0 }
 0x437   :  { %v1006_v56 = vmul.f32 1.442695, %v1005_v52  ;;  %988 = vadd.xlane.f32.xlu0 %v987_v55 }
 0x439   :  { %1327 = vpow2.f32 %v1006_v56 }
 0x443   :  { %v1328_v57 = vpop.eup %1327 }
 0x444   :  { %v1008_v58 = vsel %vm986_vm13, %v1328_v57, 0.0 }
 0x445   :  { %1009 = vadd.xlane.f32.xlu1 %v1008_v58 }
 0x4c4   :  { %v989_v59 = vpop.xlane.xlu0 %988 }
 0x4c5   :  { %v1147_v60 = vclamps-f32 %v989_v59, 0.9999999  ;;  %v1011_v63 = vmul.f32 30.0, %v989_v59 }
 0x4c7   :  { %v993_v11 = vmul.f32 %v1147_v60, %v1147_v60  ;;  %v992_v3 = vmul.f32 0.921061, %v1147_v60  ;;  %v1012_v5 = vmul.f32 1.442695, %v1011_v63 }
 0x4c9   :  { %v994_v61 = vsub.f32 1.0, %v993_v11 }
 0x4cb   :  { %1329 = vrsqrt.f32 %v994_v61  ;;  %vm997_vm14 = vcmp.eq.f32.partialorder %v994_v61, inf  ;;  %v1000_v0 = vand.u32 2147483648, %v994_v61  ;;  %vm999_vm15 = vcmp.eq.f32.partialorder %v994_v61, 0.0 }
 0x4cc   :  { %1331 = vpow2.f32 %v1012_v5 }
 0x4d2   :  { %v1010_v13 = vpop.xlane.xlu1 %1009 }
 0x4d5   :  { %v1330_v10 = vpop.eup %1329 }
 0x4d6   :  { %v996_v62 = vmul.f32 %v1330_v10, %v994_v61  ;;  %v1332_v9 = vpop.eup %1331 }
 0x4d7   :  { %v1014_v15 = vsub.f32 %v1010_v13, %v1332_v9 }
 0x4d8   :  { %v998_v1 = vsel %vm997_vm14, %v994_v61, %v996_v62 }
 0x4d9   :  { %v1001_v2 = vsel %vm999_vm15, %v1000_v0, %v998_v1 }
 0x4da   :  { %v1002_v4 = vmul.f32 0.38941833, %v1001_v2 }
 0x4dc   :  { %v1003_v6 = vsub.f32 %v992_v3, %v1002_v4 }
 0x4de   :  { %v1004_v7 = vmul.f32 30.0, %v1003_v6 }
 0x4e0   :  { %v1015_v8 = vmul.f32 1.442695, %v1004_v7 }
 0x4e2   :  { %1333 = vpow2.f32 %v1015_v8 }
 0x4ec   :  { %v1334_v12 = vpop.eup %1333 }
 0x4ed   :  { %v1017_v14 = vadd.f32 %v1334_v12, %v1014_v15 }
 0x4ef   :  { %1335 = vlog2.f32 %v1017_v14 }
 0x4f9   :  { %v1336_v16 = vpop.eup %1335 }
 0x4fa   :  { %v1019_v17 = vmul.f32 0.6931472, %v1336_v16 }
 0x4fc   :  { %v1020_v18 = vsub.f32 %v1004_v7, %v1019_v17 }
 0x4fe   :  { %v1022_v19 = vsel %vm1021_vm0, %v1020_v18, 0.0 }
 0x4ff   :  { %1023 = vadd.xlane.f32.xlu1 %v1022_v19 }
 0x58c   :  { %v1024_v20 = vpop.xlane.xlu1 %1023 }
 0x58d   :  { %v1025_v21 = vrot.slane %v1024_v20, 4 }
 0x58f   :  { %v1026_v22 = vadd.f32 %v1025_v21, %v1024_v20 }
 0x591   :  { %v1027_v23 = vrot.slane %v1026_v22, 2 }
 0x593   :  { %v1028_v24 = vadd.f32 %v1027_v23, %v1026_v22 }
 0x595   :  { %v1029_v25 = vrot.slane %v1028_v24, 1 }
 0x597   :  { %v1030_v26 = vadd.f32 %v1029_v25, %v1028_v24 }
 0x599   :  { %1196 = vpush %v1030_v26 }
 0x5ca   :  { %s1197_s25 = spop %1196 }
 0x5cb   :  { %s1032_s26 = smul.f32 -0.125, %s1197_s25 }
 0x5cd   :  { %1034 = sst [smem:[#allocation7]] %s1032_s26 }
 0x5ce   :  { %1380 = shalt.err (!%p1377_p1)
}
 0x5cf   :  { %s1395_s9 = smov [#allocation7]  }
 0x5d0   :  { %1042 = dma.smem_to_hbm %s1395_s9, 16, %s1586_s7, [#allocation4]  }
 0x5d1   :  { %1385 = dma.done.wait [#allocation4], 16  }
 0x5d2   :  { %1386 = vsyncadd [#allocation4], 4294967280 }
 0x5d3   :  { %1046 = sfence }
 0x5d4   :  { %1047 = vsyncpa [#allocation3], 1 }
 0x5d5   :  { %1048 = vsyncpa [#allocation4], 1 }
 0x5d6   :  { %1049 = vsyncpa [#allocation5], 1 }

</bundles_post_ra>
